<compile_context>
chip_gen: v5e
topology: v5e:2x2
jax: 0.10.0
libtpu: 0.0.40
codegen_flags: <defaults>
</compile_context>

<pallas_src>
import numpy as np
import jax
import jax.numpy as jnp
from jax.experimental import pallas as pl
from jax.experimental.pallas import tpu as pltpu


# ----------------------------------------------------------------------------
# Kernel: one output block  o[b, f_tile, n_tile] = W[f_tile] @ x[b, n_tile]^T + bias
# ----------------------------------------------------------------------------
def _linear_permuted_kernel(x_ref, w_ref, b_ref, o_ref):
    # x_ref : (1, tn, L)   bf16 activations for batch b, frames n_tile
    # w_ref : (tf, L)      bf16 weight tile in native nn.Linear (F, L) layout
    # b_ref : (tf, 1)      f32 bias column
    # o_ref : (1, tf, tn)  output tile of the (B, F, N) result
    x = x_ref[0]                      # (tn, L)
    w = w_ref[...]                    # (tf, L)
    # Contract the shared last dim (L) of both operands: (tf, L) x (tn, L) ->
    # (tf, tn).  This is the already-permuted orientation, so no in-kernel
    # transpose is required; accumulation stays f32 on the MXU.
    acc = jax.lax.dot_general(
        w, x,
        dimension_numbers=(((1,), (1,)), ((), ())),
        preferred_element_type=jnp.float32)
    o_ref[0] = (acc + b_ref[...]).astype(o_ref.dtype)


def _round_up(x: int, m: int) -> int:
    return ((x + m - 1) // m) * m


def _tile_and_pad(dim: int, target: int, align: int):
    """Return (tile, padded_dim).

    Small dims become a single full-extent block (always a legal Pallas block).
    Larger dims are padded up to a multiple of an `align`-aligned tile, so no
    oversized full-dim fallback block can blow the VMEM budget."""
    if dim <= target:
        return dim, dim
    tile = max(align, (target // align) * align)
    return tile, _round_up(dim, tile)


# ----------------------------------------------------------------------------
# Wrapper: OutputProcess.forward
# ----------------------------------------------------------------------------
def output_process_forward(output, weight, bias, *,
                           tn_target=512, tf_target=512,
                           compute_dtype=jnp.bfloat16):
    """output: (nframes, bs, latent_dim)
       weight: (input_feats, latent_dim)  (PyTorch nn.Linear layout, NOT transposed)
       bias  : (input_feats,)
       returns: (bs, input_feats, 1, nframes)"""
    N, B, L = output.shape
    F = weight.shape[0]
    out_dtype = output.dtype

    # Major-dim transpose (N,B,L)->(B,N,L) fused with the bf16 cast.  This lets
    # the kernel emit the final (B, F, N) layout directly (saving the much
    # larger output-side HBM round trip of the old XLA permute).
    x_bnl = jnp.transpose(output, (1, 0, 2)).astype(compute_dtype)
    w_nat = weight.astype(compute_dtype)              # (F, L), native layout
    b_col = bias.astype(jnp.float32).reshape(F, 1)    # bias as a column

    # Tile selection: lane dim of the output is nframes, its sublane dim is F.
    tn, n_pad = _tile_and_pad(N, tn_target, 128)
    tf, f_pad = _tile_and_pad(F, tf_target, 128)

    if n_pad != N:
        x_bnl = jnp.pad(x_bnl, ((0, 0), (0, n_pad - N), (0, 0)))
    if f_pad != F:
        w_nat = jnp.pad(w_nat, ((0, f_pad - F), (0, 0)))
        b_col = jnp.pad(b_col, ((0, f_pad - F), (0, 0)))

    grid = (B, n_pad // tn, f_pad // tf)   # all axes independent (no reduction)

    y = pl.pallas_call(
        _linear_permuted_kernel,
        out_shape=jax.ShapeDtypeStruct((B, f_pad, n_pad), out_dtype),
        grid_spec=pltpu.PrefetchScalarGridSpec(
            num_scalar_prefetch=0,
            grid=grid,
            in_specs=[
                pl.BlockSpec((1, tn, L), lambda b, i, j: (b, i, 0)),  # x tile
                pl.BlockSpec((tf, L), lambda b, i, j: (j, 0)),        # W tile
                pl.BlockSpec((tf, 1), lambda b, i, j: (j, 0)),        # bias col
            ],
            out_specs=pl.BlockSpec((1, tf, tn), lambda b, i, j: (b, j, i)),
        ),
        compiler_params=pltpu.CompilerParams(
            dimension_semantics=("parallel", "parallel", "parallel")),
    )(x_bnl, w_nat, b_col)

    # Strip padding (no-op when unpadded); the size-1 axis of the PyTorch
    # output layout is a metadata-only reshape.
    y = y[:, :F, :N]
    return y[:, :, None, :]                 # (bs, input_feats, 1, nframes)


# ----------------------------------------------------------------------------
if __name__ == "__main__":
    NFRAMES, BS, LATENT_DIM, INPUT_FEATS = 8, 2, 32, 48

    key = jax.random.PRNGKey(0)
    kx, kw, kb = jax.random.split(key, 3)
    x = jax.random.normal(kx, (NFRAMES, BS, LATENT_DIM), dtype=jnp.float32)
    w = jax.random.normal(kw, (INPUT_FEATS, LATENT_DIM), dtype=jnp.float32) * 0.05
    b = jax.random.normal(kb, (INPUT_FEATS,), dtype=jnp.float32) * 0.05

    out = output_process_forward(x, w, b)
    out = jax.block_until_ready(out)
    assert out.shape == (BS, INPUT_FEATS, 1, NFRAMES)

    # Pure-JAX reference of the PyTorch forward.  The kernel feeds the MXU
    # bf16 operands with f32 accumulation, so the reference rounds the
    # operands to bf16 the same way; the remaining difference is f32
    # accumulation order only.
    xr = x.astype(jnp.bfloat16).astype(jnp.float32)
    wr = w.astype(jnp.bfloat16).astype(jnp.float32)
    ref = jnp.einsum("nbl,fl->nbf", xr, wr,
                     preferred_element_type=jnp.float32) + b
    ref = jnp.transpose(ref.reshape(NFRAMES, BS, INPUT_FEATS, 1), (1, 2, 3, 0))
    np.testing.assert_allclose(np.asarray(out), np.asarray(ref),
                               rtol=1e-4, atol=1e-4)

    print("KERNEL_OK")
</pallas_src>

<mosaic_0001>
module attributes {stable_mosaic.version = 11 : i64} {
  func.func @_linear_permuted_kernel(%arg0: i32, %arg1: i32, %arg2: i32, %arg3: memref<1x8x32xbf16, #tpu.memory_space<vmem>>, %arg4: memref<48x32xbf16, #tpu.memory_space<vmem>>, %arg5: memref<48x1xf32, #tpu.memory_space<vmem>>, %arg6: memref<1x48x8xf32, #tpu.memory_space<vmem>>) attributes {dimension_semantics = [#tpu.dimension_semantics<parallel>, #tpu.dimension_semantics<parallel>, #tpu.dimension_semantics<parallel>], iteration_bounds = array<i64: 2, 1, 1>, scalar_prefetch = 0 : i64, scratch_operands = 0 : i64, tpu.core_type = #tpu.core_type<tc>, window_params = [{transform_indices = @transform_0, window_bounds = array<i64: 1, 8, 32>}, {transform_indices = @transform_1, window_bounds = array<i64: 48, 32>}, {transform_indices = @transform_2, window_bounds = array<i64: 48, 1>}, {transform_indices = @transform_3, window_bounds = array<i64: 1, 48, 8>}]} {
    %c0 = arith.constant 0 : index
    %c0_0 = arith.constant 0 : index
    %c0_1 = arith.constant 0 : index
    %0 = vector.load %arg3[%c0, %c0_0, %c0_1] : memref<1x8x32xbf16, #tpu.memory_space<vmem>>, vector<1x8x32xbf16>
    %1 = vector.shape_cast %0 : vector<1x8x32xbf16> to vector<8x32xbf16>
    %c0_2 = arith.constant 0 : index
    %c0_3 = arith.constant 0 : index
    %2 = vector.load %arg4[%c0_2, %c0_3] : memref<48x32xbf16, #tpu.memory_space<vmem>>, vector<48x32xbf16>
    %cst = arith.constant dense<0.000000e+00> : vector<48x8xf32>
    %3 = tpu.matmul %2, %1, %cst {dimension_numbers = #tpu.dot_dimension_numbers<[1], [1], [0], [0], [0, 0, 1, 0], [], []>} : vector<48x32xbf16>, vector<8x32xbf16>, vector<48x8xf32> -> vector<48x8xf32>
    %c0_4 = arith.constant 0 : index
    %c0_5 = arith.constant 0 : index
    %4 = vector.load %arg5[%c0_4, %c0_5] : memref<48x1xf32, #tpu.memory_space<vmem>>, vector<48x1xf32>
    %5 = vector.broadcast %4 : vector<48x1xf32> to vector<48x8xf32>
    %6 = arith.addf %3, %5 : vector<48x8xf32>
    %c0_6 = arith.constant 0 : index
    %c0_7 = arith.constant 0 : index
    %c0_8 = arith.constant 0 : index
    %7 = vector.load %arg6[%c0_6, %c0_7, %c0_8] : memref<1x48x8xf32, #tpu.memory_space<vmem>>, vector<1x48x8xf32>
    %8 = vector.shape_cast %7 : vector<1x48x8xf32> to vector<48x8xf32>
    %9 = vector.shape_cast %6 : vector<48x8xf32> to vector<1x48x8xf32>
    tpu.vector_store %arg6[%c0_6, %c0_7, %c0_8], %9 {strides = array<i32>} : memref<1x48x8xf32, #tpu.memory_space<vmem>>, vector<1x48x8xf32>,
    return
  }
  func.func @transform_0(%arg0: i32, %arg1: i32, %arg2: i32) -> (i32, i32, i32) {
    %c0_i32 = arith.constant 0 : i32
    %c0_i32_0 = arith.constant 0 : i32
    return %arg0, %arg1, %c0_i32 : i32, i32, i32
  }
  func.func @transform_1(%arg0: i32, %arg1: i32, %arg2: i32) -> (i32, i32) {
    %c0_i32 = arith.constant 0 : i32
    %c0_i32_0 = arith.constant 0 : i32
    return %arg2, %c0_i32 : i32, i32
  }
  func.func @transform_2(%arg0: i32, %arg1: i32, %arg2: i32) -> (i32, i32) {
    %c0_i32 = arith.constant 0 : i32
    %c0_i32_0 = arith.constant 0 : i32
    return %arg2, %c0_i32 : i32, i32
  }
  func.func @transform_3(%arg0: i32, %arg1: i32, %arg2: i32) -> (i32, i32, i32) {
    %c0_i32 = arith.constant 0 : i32
    return %arg0, %arg2, %arg1 : i32, i32, i32
  }
}

</mosaic_0001>

<bundles_post_ra>
// kernel: tpu_custom_call.1
= control target key start
LH: loop header
LB: loop body
LE: loop exit
PB: predicated region body
PF: predicated region fallthrough
CT: control target
= control target key end

     0   :  { %s596_s12 = smov 0   ;;  %s598_s13 = smov 0   ;;  %s670_s0 = inlined_call_operand.vmem [shape: bf16[2,8,32], index: 0, kind: input, shape index: {}]   ;;  %s671_s1 = inlined_call_operand.vmem [shape: bf16[48,32], index: 1, kind: input, shape index: {}]   ;;  %s672_s2 = inlined_call_operand.vmem [shape: f32[48,1], index: 2, kind: input, shape index: {}]   ;;  %s673_s3 = inlined_call_operand.vmem [shape: f32[2,48,8], index: 3, kind: output, shape index: {}]  }
   0x1   :  { %s600_s14 = smov 0  }
   0x2 LB: > { %s32_s15 = sadd.s32 1, %s569_s13  ;;  %p497_p0 = scmp.ge.s32.totalorder %s573_s14, 1  ;;  %s573_s14 = sphi %s600_s14, %s13_s14   ;;  %s569_s13 = sphi %s598_s13, %s675_s13   ;;  %s565_s12 = sphi %s596_s12, %s674_s12  }
   0x3   : > { %p34_p1 = scmp.ge.s32.totalorder %s32_s15, 2  ;;  %p186_p2 = scmp.lt.s32.totalorder %s573_s14, 3 }
   0x5   : > { %s677_s15 = smov (%p34_p1, %s32_s15), 0  ;;  %p187_p3 = pnand %p497_p0, %p186_p2 }
   0x6   : > { %p229_p4 = scmp.lt.s32.totalorder (!%p187_p3), %s565_s12, 1 }
   0x7   : > { %190 = sbr.rel (%p187_p3) target bundleno = 168 (0xa8), region = 32 }
   0xc   : > { %v575_v0 = vmov 0   ;;  %v271_v1 = vld [vmem:[%s672_s2 + $0x10] sm:$0xff]  ;;  %v269_v2 = vld [vmem:[%s672_s2] sm:$0xff]  ;;  %s679_s12 = smov (!%p229_p4, %s565_s12), 1  ;;  %vm320_vm0 = vcmask 261120   ;;  %v272_v6 = vld [vmem:[%s672_s2 + $0x18] sm:$0xff] }
   0xd   : > { %549 = vset.pattern.permute.xlu1 %v575_v0  ;;  %548 = vset.pattern.permute.xlu0 %v575_v0  ;;  %v273_v3 = vld [vmem:[%s672_s2 + $0x20] sm:$0xff]  ;;  %s498_s22 = sshll.u32 %s679_s12, 2  ;;  %v270_v7 = vld [vmem:[%s672_s2 + $0x8] sm:$0xff]  ;;  %v519_v11 = vld [vmem:[%s671_s1 + $0x10] sm:$0xff]  ;;  %s522_s11 = smul.u32 48, %s679_s12  ;;  %vm357_vm1 = vcmask 64512  }
   0xe   : > { %287 = vperm.xlu1 %549, %v271_v1   ;;  %277 = vperm.xlu0 %548, %v269_v2   ;;  %s235_s25 = scalar_lea.vmem %s670_s0, %s498_s22  ;;  %v274_v8 = vld [vmem:[%s672_s2 + $0x28] sm:$0xff]  ;;  %v517_v9 = vld [vmem:[%s671_s1] sm:$0xff] }
   0xf   : > { %550 = vset.pattern.permute.xlu2 %v575_v0  ;;  %v262_v4 = vld [vmem:[%s235_s25] sm:$0xf]  ;;  %v518_v10 = vld [vmem:[%s671_s1 + $0x8] sm:$0xff]  ;;  %s259_s18 = scalar_lea.vmem %s673_s3, %s522_s11 }
  0x10   : > { %297 = vperm.xlu2 %550, %v273_v3   ;;  %v331_v5 = vsel %vm320_vm0, %v262_v4, 0 }
  0x11   : > { %340 = vmatpush.bf16.xpose.msra.mxu0 %v331_v5  ;;  %520 = vmatpush.bf16.xpose.msra.mxu1 %v331_v5 }
  0x12   : > { %521 = vmatpush.bf16.xpose.msra.mxu2 %v331_v5 }
  0x16   : > { %292 = vperm.xlu1 %549, %v272_v6   ;;  %282 = vperm.xlu0 %548, %v270_v7  }
  0x18   : > { %302 = vperm.xlu2 %550, %v274_v8   ;;  %512 = vmatmul.msk.bf16.vlgmr.msra.gmra.mxu0 %vm320_vm0, %v517_v9 }
  0x19   : > { %513 = vmatmul.msk.bf16.vlgmr.msra.gmra.mxu1 %vm320_vm0, %v518_v10  ;;  %514 = vmatmul.msk.bf16.vlgmr.msra.gmra.mxu2 %vm320_vm0, %v519_v11 }
  0x6a   : > { %v298_v18 = vpop.permute.xlu2 %297 }
  0x72   : > { %v303_v27 = vpop.permute.xlu2 %302 }
  0x80   : > { %v288_v12 = vpop.permute.xlu1 %287  ;;  %v278_v13 = vpop.permute.xlu0 %277 }
  0x88   : > { %v293_v19 = vpop.permute.xlu1 %292  ;;  %v283_v20 = vpop.permute.xlu0 %282 }
  0x95   : > { %v342_v14 = vpop.f32.mrf.mxu0 }
  0x96   : > { %v347_v15 = vpop.f32.mrf.mxu1  ;;  %v343_v16 = vadd.f32 %v342_v14, %v278_v13 }
  0x97   : > { %v348_v17 = vadd.f32 %v347_v15, %v288_v12 }
  0x98   : > { %358 = vst.msk [vmem:[%s259_s18] sm:$0xff] %vm357_vm1, %v343_v16 }
  0x99   : > { %360 = vst.msk [vmem:[%s259_s18 + $0x10] sm:$0xff] %vm357_vm1, %v348_v17 }
  0x9c   : > { %v352_v21 = vpop.f32.mrf.mxu2 }
  0x9d   : > { %v353_v22 = vadd.f32 %v352_v21, %v298_v18  ;;  %v344_v23 = vpop.f32.mrf.mxu0 }
  0x9e   : > { %v349_v24 = vpop.f32.mrf.mxu1  ;;  %v345_v25 = vadd.f32 %v344_v23, %v283_v20 }
  0x9f   : > { %v350_v26 = vadd.f32 %v349_v24, %v293_v19  ;;  %362 = vst.msk [vmem:[%s259_s18 + $0x20] sm:$0xff] %vm357_vm1, %v353_v22 }
  0xa0   : > { %359 = vst.msk [vmem:[%s259_s18 + $0x8] sm:$0xff] %vm357_vm1, %v345_v25 }
  0xa1   : > { %361 = vst.msk [vmem:[%s259_s18 + $0x18] sm:$0xff] %vm357_vm1, %v350_v26 }
  0xa4   : > { %v354_v28 = vpop.f32.mrf.mxu2 }
  0xa5   : > { %v355_v29 = vadd.f32 %v354_v28, %v303_v27 }
  0xa7   : > { %363 = vst.msk [vmem:[%s259_s18 + $0x28] sm:$0xff] %vm357_vm1, %v355_v29 }
  0xa8 PF: > { %s13_s14 = sadd.s32 1, %s573_s14   ;;  %s674_s12 = smov %s569_s13 }
  0xa9   : > { %p10_p5 = scmp.ge.s32.totalorder %s13_s14, 4   ;;  %s675_s13 = smov %s677_s15 }
  0xab   :  { %12 = sbr.rel (!%p10_p5) target bundleno = 2 (0x2), region = 68 }

</bundles_post_ra>
